<compile_context>
chip_gen: v7x
topology: tpu7x:2x2x1
jax: 0.10.0
libtpu: 0.0.40
codegen_flags: <defaults>
</compile_context>

<pallas_src>
import functools

import jax
import jax.numpy as jnp
from jax import lax
from jax.experimental import pallas as pl
from jax.experimental.pallas import tpu as pltpu

# Deterministic "parameters" the module's forward references but __init__
# never defines (synthetic init, not a checkpoint load).
MARGIN = 0.2
MARGIN_INCREMENT = 0.01
EPS = 1e-8  # torch.nn.CosineSimilarity default eps
# TODO(synk): modern torch clamps the *product* of norms (max(||a||*||b||, eps));
# we keep the per-norm clamp of the original kernel, identical except for
# near-zero vectors.

# VMEM budgeting: 3 input streams x 2 double-buffers x TB x D x 4 B must stay
# under this; 32 MiB + output buffers leaves headroom on v7x (64 MiB physical).
_VMEM_TILE_BUDGET = 32 * 1024 * 1024
_VMEM_LIMIT_BYTES = 48 * 1024 * 1024  # < 64 MiB (v7x), << 128 MiB (v5e/v6e)
_MAX_TILE_ROWS = 2048                 # diminishing returns past ~0.5-1k rows


def _pick_tile_rows(batch: int, dim: int) -> int:
    """Largest multiple-of-8 row tile that keeps double-buffering in budget."""
    max_rows = _VMEM_TILE_BUDGET // (3 * 2 * dim * 4)
    tb = min(batch, max(8, max_rows), _MAX_TILE_ROWS)
    if tb < batch:
        tb = max(8, (tb // 8) * 8)  # (8,128) tiling rule for partial blocks
    return tb


def _triplet_cosine_kernel(margin_ref, a_ref, p_ref, n_ref, psum_ref, *,
                           batch, tile_rows):
    """Per-tile kernel.

    margin_ref : SMEM (1,) f32      -- currentMargin (scalar prefetch)
    a/p/n_ref  : VMEM (TB, D) f32   -- anchor / positive / negative tile
    psum_ref   : VMEM (1, 8, 128) f32 -- tile loss-sum broadcast to a full vreg
    """
    i = pl.program_id(0)

    a = a_ref[...].astype(jnp.float32)
    p = p_ref[...].astype(jnp.float32)
    n = n_ref[...].astype(jnp.float32)

    # Row-wise dot products / squared norms (lane-axis reductions -> (TB, 1)).
    dot_ap = jnp.sum(a * p, axis=1, keepdims=True)
    dot_an = jnp.sum(a * n, axis=1, keepdims=True)
    ss_a = jnp.sum(a * a, axis=1, keepdims=True)
    ss_p = jnp.sum(p * p, axis=1, keepdims=True)
    ss_n = jnp.sum(n * n, axis=1, keepdims=True)

    # 1 / max(||x||, eps) == rsqrt(max(||x||^2, eps^2)); rsqrt runs on the EUP.
    eps_sq = EPS * EPS
    inv_na = lax.rsqrt(jnp.maximum(ss_a, eps_sq))
    inv_np = lax.rsqrt(jnp.maximum(ss_p, eps_sq))
    inv_nn = lax.rsqrt(jnp.maximum(ss_n, eps_sq))

    cos_ap = dot_ap * (inv_na * inv_np)
    cos_an = dot_an * (inv_na * inv_nn)

    # (1 - cos_ap) - (1 - cos_an) + m == cos_an - cos_ap + m
    margin = margin_ref[0]
    losses = jnp.maximum(cos_an - cos_ap + margin, 0.0)  # (TB, 1)

    # Mask rows of the ragged last tile (padded rows would contribute `margin`).
    row = i * tile_rows + lax.broadcasted_iota(jnp.int32, losses.shape, 0)
    losses = jnp.where(row < batch, losses, 0.0)

    tile_sum = jnp.sum(losses)
    # Lane-dense, full-vreg output block (legal (8,128)-tiled block, unmasked
    # store); wrapper reads element [i, 0, 0] of each tile.
    psum_ref[...] = jnp.broadcast_to(tile_sum, (1, 8, 128))


def custom_3x3_loss(anchor, positive, negative, epoch, *, tile_rows=None):
    """Wrapper: margin scalar + tiling in JAX/Python, hot path in Pallas."""
    assert epoch > -1, "PyTorch forward only defines currentMargin for epoch > -1"
    batch, dim = anchor.shape
    tb = tile_rows if tile_rows is not None else _pick_tile_rows(batch, dim)
    grid = pl.cdiv(batch, tb)

    current_margin = jnp.asarray(
        [MARGIN + MARGIN_INCREMENT * epoch], dtype=jnp.float32
    )

    kernel = functools.partial(
        _triplet_cosine_kernel, batch=batch, tile_rows=tb
    )

    grid_spec = pltpu.PrefetchScalarGridSpec(
        num_scalar_prefetch=1,  # currentMargin -> SMEM, visible to index_maps
        grid=(grid,),
        in_specs=[
            pl.BlockSpec((tb, dim), lambda i, m: (i, 0)),  # anchor
            pl.BlockSpec((tb, dim), lambda i, m: (i, 0)),  # positive
            pl.BlockSpec((tb, dim), lambda i, m: (i, 0)),  # negative
        ],
        out_specs=pl.BlockSpec((1, 8, 128), lambda i, m: (i, 0, 0)),
    )

    partials = pl.pallas_call(
        kernel,
        out_shape=jax.ShapeDtypeStruct((grid, 8, 128), jnp.float32),
        grid_spec=grid_spec,
        compiler_params=pltpu.CompilerParams(
            # Each grid step owns its own output block -> independent, so the
            # axis can be sharded across v7x's two TensorCores.
            dimension_semantics=("parallel",),
            vmem_limit_bytes=_VMEM_LIMIT_BYTES,
        ),
        cost_estimate=pl.CostEstimate(
            flops=10 * batch * dim,          # 5 fused mul+reduce streams
            transcendentals=3 * batch,       # 3 rsqrt per row
            bytes_accessed=3 * batch * dim * 4 + grid * 8 * 128 * 4,
        ),
    )(current_margin, anchor, positive, negative)

    # Tiny final reduction + mean (divide by the *true* batch size).
    return jnp.sum(partials[:, 0, 0]) / batch


def _reference(anchor, positive, negative, epoch):
    """Pure-JAX reference mirroring the PyTorch forward."""
    margin = MARGIN + MARGIN_INCREMENT * epoch

    def cos(x1, x2):
        dot = jnp.sum(x1 * x2, axis=1)
        n1 = jnp.maximum(jnp.linalg.norm(x1, axis=1), EPS)
        n2 = jnp.maximum(jnp.linalg.norm(x2, axis=1), EPS)
        return dot / (n1 * n2)

    d_ap = 1.0 - cos(anchor, positive)
    d_an = 1.0 - cos(anchor, negative)
    return jnp.mean(jnp.maximum(d_ap - d_an + margin, 0.0))


if __name__ == "__main__":
    key = jax.random.PRNGKey(0)
    epoch = 3

    # Case 1: small, single-tile path (batch=8, dim=128).
    k_a, k_p, k_n, key = jax.random.split(key, 4)
    anchor = jax.random.normal(k_a, (8, 128), dtype=jnp.float32)
    positive = jax.random.normal(k_p, (8, 128), dtype=jnp.float32)
    negative = jax.random.normal(k_n, (8, 128), dtype=jnp.float32)

    loss = custom_3x3_loss(anchor, positive, negative, epoch)
    jax.block_until_ready(loss)
    ref = _reference(anchor, positive, negative, epoch)
    assert jnp.allclose(loss, ref, rtol=1e-5, atol=1e-5), (loss, ref)

    # Case 2: multi-tile grid with a ragged last tile (batch=40, tile_rows=16
    # -> grid of 3, last tile half-masked) to exercise pipelining + masking.
    k_a, k_p, k_n, key = jax.random.split(key, 4)
    anchor2 = jax.random.normal(k_a, (40, 128), dtype=jnp.float32)
    positive2 = jax.random.normal(k_p, (40, 128), dtype=jnp.float32)
    negative2 = jax.random.normal(k_n, (40, 128), dtype=jnp.float32)

    loss2 = custom_3x3_loss(anchor2, positive2, negative2, epoch, tile_rows=16)
    jax.block_until_ready(loss2)
    ref2 = _reference(anchor2, positive2, negative2, epoch)
    assert jnp.allclose(loss2, ref2, rtol=1e-5, atol=1e-5), (loss2, ref2)

    print("KERNEL_OK")
</pallas_src>

<mosaic_0001>
module attributes {stable_mosaic.version = 11 : i64} {
  func.func @_triplet_cosine_kernel(%arg0: i32, %arg1: memref<1xf32, #tpu.memory_space<smem>>, %arg2: memref<8x128xf32, #tpu.memory_space<vmem>>, %arg3: memref<8x128xf32, #tpu.memory_space<vmem>>, %arg4: memref<8x128xf32, #tpu.memory_space<vmem>>, %arg5: memref<1x8x128xf32, #tpu.memory_space<vmem>>) attributes {dimension_semantics = [#tpu.dimension_semantics<parallel>], iteration_bounds = array<i64: 1>, scalar_prefetch = 1 : i64, scratch_operands = 0 : i64, tpu.core_type = #tpu.core_type<tc>, window_params = [{transform_indices = @transform_0, window_bounds = array<i64: 8, 128>}, {transform_indices = @transform_1, window_bounds = array<i64: 8, 128>}, {transform_indices = @transform_2, window_bounds = array<i64: 8, 128>}, {transform_indices = @transform_3, window_bounds = array<i64: 1, 8, 128>}]} {
    %c0 = arith.constant 0 : index
    %c0_0 = arith.constant 0 : index
    %0 = vector.load %arg2[%c0, %c0_0] : memref<8x128xf32, #tpu.memory_space<vmem>>, vector<8x128xf32>
    %c0_1 = arith.constant 0 : index
    %c0_2 = arith.constant 0 : index
    %1 = vector.load %arg3[%c0_1, %c0_2] : memref<8x128xf32, #tpu.memory_space<vmem>>, vector<8x128xf32>
    %c0_3 = arith.constant 0 : index
    %c0_4 = arith.constant 0 : index
    %2 = vector.load %arg4[%c0_3, %c0_4] : memref<8x128xf32, #tpu.memory_space<vmem>>, vector<8x128xf32>
    %3 = arith.mulf %0, %1 : vector<8x128xf32>
    %cst = arith.constant dense<0.000000e+00> : vector<8xf32>
    %4 = vector.multi_reduction <add>, %3, %cst [1] : vector<8x128xf32> to vector<8xf32>
    %5 = vector.shape_cast %4 : vector<8xf32> to vector<8x1xf32>
    %6 = arith.mulf %0, %2 : vector<8x128xf32>
    %cst_5 = arith.constant dense<0.000000e+00> : vector<8xf32>
    %7 = vector.multi_reduction <add>, %6, %cst_5 [1] : vector<8x128xf32> to vector<8xf32>
    %8 = vector.shape_cast %7 : vector<8xf32> to vector<8x1xf32>
    %9 = arith.mulf %0, %0 : vector<8x128xf32>
    %cst_6 = arith.constant dense<0.000000e+00> : vector<8xf32>
    %10 = vector.multi_reduction <add>, %9, %cst_6 [1] : vector<8x128xf32> to vector<8xf32>
    %11 = vector.shape_cast %10 : vector<8xf32> to vector<8x1xf32>
    %12 = arith.mulf %1, %1 : vector<8x128xf32>
    %cst_7 = arith.constant dense<0.000000e+00> : vector<8xf32>
    %13 = vector.multi_reduction <add>, %12, %cst_7 [1] : vector<8x128xf32> to vector<8xf32>
    %14 = vector.shape_cast %13 : vector<8xf32> to vector<8x1xf32>
    %15 = arith.mulf %2, %2 : vector<8x128xf32>
    %cst_8 = arith.constant dense<0.000000e+00> : vector<8xf32>
    %16 = vector.multi_reduction <add>, %15, %cst_8 [1] : vector<8x128xf32> to vector<8xf32>
    %17 = vector.shape_cast %16 : vector<8xf32> to vector<8x1xf32>
    %cst_9 = arith.constant 1.000000e-16 : f32
    %18 = vector.broadcast %cst_9 : f32 to vector<8x1xf32>
    %19 = arith.maximumf %11, %18 : vector<8x1xf32>
    %20 = math.rsqrt %19 : vector<8x1xf32>
    %cst_10 = arith.constant 1.000000e-16 : f32
    %21 = vector.broadcast %cst_10 : f32 to vector<8x1xf32>
    %22 = arith.maximumf %14, %21 : vector<8x1xf32>
    %23 = math.rsqrt %22 : vector<8x1xf32>
    %cst_11 = arith.constant 1.000000e-16 : f32
    %24 = vector.broadcast %cst_11 : f32 to vector<8x1xf32>
    %25 = arith.maximumf %17, %24 : vector<8x1xf32>
    %26 = math.rsqrt %25 : vector<8x1xf32>
    %27 = arith.mulf %20, %23 : vector<8x1xf32>
    %28 = arith.mulf %5, %27 : vector<8x1xf32>
    %29 = arith.mulf %20, %26 : vector<8x1xf32>
    %30 = arith.mulf %8, %29 : vector<8x1xf32>
    %c0_12 = arith.constant 0 : index
    %31 = memref.load %arg1[%c0_12] : memref<1xf32, #tpu.memory_space<smem>>
    %32 = arith.subf %30, %28 : vector<8x1xf32>
    %33 = vector.broadcast %31 : f32 to vector<8x1xf32>
    %34 = arith.addf %32, %33 : vector<8x1xf32>
    %cst_13 = arith.constant 0.000000e+00 : f32
    %35 = vector.broadcast %cst_13 : f32 to vector<8x1xf32>
    %36 = arith.maximumf %34, %35 : vector<8x1xf32>
    %c8_i32 = arith.constant 8 : i32
    %37 = arith.muli %arg0, %c8_i32 : i32
    %38 = tpu.iota {dimensions = array<i32: 0>} : vector<8x1xi32>
    %39 = vector.broadcast %37 : i32 to vector<8x1xi32>
    %40 = arith.addi %39, %38 : vector<8x1xi32>
    %c8_i32_14 = arith.constant 8 : i32
    %41 = vector.broadcast %c8_i32_14 : i32 to vector<8x1xi32>
    %42 = arith.cmpi slt, %40, %41 : vector<8x1xi32>
    %cst_15 = arith.constant 0.000000e+00 : f32
    %43 = vector.broadcast %cst_15 : f32 to vector<8x1xf32>
    %44 = arith.select %42, %36, %43 : vector<8x1xi1>, vector<8x1xf32>
    %45 = vector.shape_cast %44 : vector<8x1xf32> to vector<1x8x1xf32>
    %cst_16 = arith.constant dense<0.000000e+00> : vector<1xf32>
    %46 = vector.multi_reduction <add>, %45, %cst_16 [1, 2] : vector<1x8x1xf32> to vector<1xf32>
    %47 = vector.shape_cast %46 : vector<1xf32> to vector<1x1x1xf32>
    %48 = vector.extract %47[0, 0, 0] : f32 from vector<1x1x1xf32>
    %49 = vector.broadcast %48 : f32 to vector<1x8x128xf32>
    %c0_17 = arith.constant 0 : index
    %c0_18 = arith.constant 0 : index
    %c0_19 = arith.constant 0 : index
    %50 = vector.load %arg5[%c0_17, %c0_18, %c0_19] : memref<1x8x128xf32, #tpu.memory_space<vmem>>, vector<1x8x128xf32>
    tpu.vector_store %arg5[%c0_17, %c0_18, %c0_19], %49 {strides = array<i32>} : memref<1x8x128xf32, #tpu.memory_space<vmem>>, vector<1x8x128xf32>,
    return
  }
  func.func @transform_0(%arg0: i32, %arg1: memref<1xf32, #tpu.memory_space<smem>>) -> (i32, i32) {
    %c0_i32 = arith.constant 0 : i32
    %c0_i32_0 = arith.constant 0 : i32
    return %arg0, %c0_i32 : i32, i32
  }
  func.func @transform_1(%arg0: i32, %arg1: memref<1xf32, #tpu.memory_space<smem>>) -> (i32, i32) {
    %c0_i32 = arith.constant 0 : i32
    %c0_i32_0 = arith.constant 0 : i32
    return %arg0, %c0_i32 : i32, i32
  }
  func.func @transform_2(%arg0: i32, %arg1: memref<1xf32, #tpu.memory_space<smem>>) -> (i32, i32) {
    %c0_i32 = arith.constant 0 : i32
    %c0_i32_0 = arith.constant 0 : i32
    return %arg0, %c0_i32 : i32, i32
  }
  func.func @transform_3(%arg0: i32, %arg1: memref<1xf32, #tpu.memory_space<smem>>) -> (i32, i32, i32) {
    %c0_i32 = arith.constant 0 : i32
    %c0_i32_0 = arith.constant 0 : i32
    %c0_i32_1 = arith.constant 0 : i32
    return %arg0, %c0_i32, %c0_i32_0 : i32, i32, i32
  }
}

</mosaic_0001>

<bundles_post_ra>
// kernel: tpu_custom_call.1
= control target key start
LH: loop header
LB: loop body
LE: loop exit
PB: predicated region body
PF: predicated region fallthrough
CT: control target
= control target key end

     0   :  { %10 = vsyncpa [#allocation5], 0  ;;  %s263_s0 = inlined_call_operand.<no memory space> [shape: f32[1], index: 0, kind: input, shape index: {}]   ;;  %s264_s1 = inlined_call_operand.hbm [shape: f32[8,128], index: 1, kind: input, shape index: {}]   ;;  %s265_s2 = inlined_call_operand.hbm [shape: f32[8,128], index: 2, kind: input, shape index: {}]   ;;  %s266_s3 = inlined_call_operand.vmem [shape: f32[8,128], index: 3, kind: input, shape index: {}]   ;;  %s267_s4 = inlined_call_operand.hbm [shape: f32[1,8,128], index: 4, kind: output, shape index: {}]  }
   0x1   :  { %11 = vsyncpa [#allocation8], 0 }
   0x2   :  { %12 = vsyncpa [#allocation6], 0  ;;  %s193_s15 = smov [#allocation4]   ;;  %s194_s17 = smov [#allocation7]  }
   0x3   :  { %s19_s16 = sshll.u32 %s193_s15, 4  ;;  %s29_s18 = sshll.u32 %s194_s17, 4  ;;  %s20_s16 = int_to_ptr.vmem [resolvable:$true] %s19_s16  ;;  %s30_s18 = int_to_ptr.vmem [resolvable:$true] %s29_s18 }
   0x4   :  { %s121_s21 = scalar_lea.hbm %s264_s1, 128 }
   0x5   :  { %p122_p0 = scmp.ne.s32.totalorder %s264_s1, %s121_s21  ;;  %p125_p1 = scmp.lt.u32.totalorder %s121_s21, %s264_s1 }
   0x7   :  { %p127_p2 = pnand %p125_p1, %p122_p0 }
   0x9   :  { %130 = shalt.err (!%p127_p2)
}
   0xa   :  { %s131_s26 = scalar_lea.vmem %s20_s16, 128  ;;  %p136_p4 = scmp.lt.s32.totalorder %s20_s16, %s20_s16 }
   0xb   :  { %p132_p3 = scmp.ne.s32.totalorder %s20_s16, %s131_s26  ;;  %p137_p5 = scmp.lt.s32.totalorder %s131_s26, %s131_s26 }
   0xd   :  { %p138_p6 = por %p137_p5, %p136_p4 }
   0xf   :  { %p139_p7 = pnand %p138_p6, %p132_p3 }
  0x11   :  { %142 = shalt.err (!%p139_p7)
}
  0x12   :  { %22 = dma.hbm_to_vmem [thread:$0]  %s264_s1, 128, %s20_s16, [#allocation5]  }
  0x13   :  { %s143_s5 = scalar_lea.hbm %s265_s2, 128 }
  0x14   :  { %p144_p8 = scmp.ne.s32.totalorder %s265_s2, %s143_s5  ;;  %p147_p9 = scmp.lt.u32.totalorder %s143_s5, %s265_s2 }
  0x16   :  { %p149_p10 = pnand %p147_p9, %p144_p8 }
  0x18   :  { %152 = shalt.err (!%p149_p10)
}
  0x19   :  { %s153_s10 = scalar_lea.vmem %s30_s18, 128  ;;  %p158_p12 = scmp.lt.s32.totalorder %s30_s18, %s30_s18 }
  0x1a   :  { %p154_p11 = scmp.ne.s32.totalorder %s30_s18, %s153_s10  ;;  %p159_p13 = scmp.lt.s32.totalorder %s153_s10, %s153_s10 }
  0x1c   :  { %p160_p0 = por %p159_p13, %p158_p12 }
  0x1e   :  { %p161_p1 = pnand %p160_p0, %p154_p11 }
  0x20   :  { %164 = shalt.err (!%p161_p1)
}
  0x21   :  { %32 = dma.hbm_to_vmem [thread:$0]  %s265_s2, 128, %s30_s18, [#allocation8]  }
  0x22   :  { %187 = dma.done.wait [#allocation5], 128  }
  0x23   :  { %188 = vsyncadd [#allocation5], 4294967168 }
  0x24   :  { %189 = dma.done.wait [#allocation8], 128  }
  0x25   :  { %190 = vsyncadd [#allocation8], 4294967168  ;;  %v43_v0 = vld [vmem:[%s266_s3] sm:$0xff]  ;;  %v42_v2 = vld [vmem:[#allocation7] sm:$0xff]  ;;  %v71_v23 = vstv %s263_s0  ;;  %vm81_vm0 = vcmask 7168   ;;  %s195_s14 = smov [#allocation9]  }
  0x26   :  { %v41_v1 = vld [vmem:[#allocation4] sm:$0xff]  ;;  %v56_v3 = vmul.f32 %v43_v0, %v43_v0  ;;  %v53_v5 = vmul.f32 %v42_v2, %v42_v2  ;;  %s100_s15 = sshll.u32 %s195_s14, 4  ;;  %s101_s15 = int_to_ptr.vmem [resolvable:$true] %s100_s15 }
  0x27   :  { %v50_v4 = vmul.f32 %v41_v1, %v41_v1  ;;  %v44_v6 = vmul.f32 %v42_v2, %v41_v1  ;;  %v47_v7 = vmul.f32 %v43_v0, %v41_v1  ;;  %s165_s0 = scalar_lea.vmem %s101_s15, 128  ;;  %p170_p3 = scmp.lt.s32.totalorder %s101_s15, %s101_s15 }
  0x28   :  { %57 = vadd.xlane.f32.xlu1 %v56_v3  ;;  %p166_p2 = scmp.ne.s32.totalorder %s101_s15, %s165_s0  ;;  %p171_p4 = scmp.lt.s32.totalorder %s165_s0, %s165_s0 }
  0x29   :  { %51 = vadd.xlane.f32.xlu0 %v50_v4 }
  0x2a   :  { %p172_p5 = por %p171_p4, %p170_p3 }
  0x2c   :  { %45 = vadd.xlane.f32.xlu1 %v44_v6  ;;  %p173_p6 = pnand %p172_p5, %p166_p2 }
  0x2d   :  { %54 = vadd.xlane.f32.xlu0 %v53_v5 }
  0x31   :  { %48 = vadd.xlane.f32.xlu0 %v47_v7 }
  0xb5   :  { %v58_v8 = vpop.xlane.xlu1 %57 }
  0xb6   :  { %v52_v9 = vpop.xlane.xlu0 %51  ;;  %v63_v10 = vmax.f32 %v58_v8, 1e-16 }
  0xb7   :  { %v59_v11 = vmax.f32 %v52_v9, 1e-16 }
  0xb8   :  { %115 = vrsqrt.f32 %v63_v10 }
  0xb9   :  { %117 = vrsqrt.f32 %v59_v11  ;;  %v46_v19 = vpop.xlane.xlu1 %45 }
  0xba   :  { %v55_v12 = vpop.xlane.xlu0 %54 }
  0xbb   :  { %v61_v13 = vmax.f32 %v55_v12, 1e-16 }
  0xbd   :  { %119 = vrsqrt.f32 %v61_v13 }
  0xbe   :  { %v49_v18 = vpop.xlane.xlu0 %48 }
  0xc2   :  { %v116_v14 = vpop.eup %115 }
  0xc3   :  { %v118_v15 = vpop.eup %117 }
  0xc4   :  { %v67_v16 = vmul.f32 %v118_v15, %v116_v14 }
  0xc6   :  { %v68_v21 = vmul.f32 %v67_v16, %v49_v18 }
  0xc7   :  { %v120_v17 = vpop.eup %119 }
  0xc8   :  { %v65_v20 = vmul.f32 %v120_v17, %v118_v15 }
  0xca   :  { %v66_v22 = vmul.f32 %v65_v20, %v46_v19 }
  0xcc   :  { %v70_v24 = vsub.f32 %v68_v21, %v66_v22 }
  0xce   :  { %v72_v25 = vadd.f32 %v71_v23, %v70_v24 }
  0xd0   :  { %v73_v26 = vmax.f32 %v72_v25, 0.0 }
  0xd2   :  { %v82_v27 = vsel %vm81_vm0, %v73_v26, 0.0 }
  0xd3   :  { %83 = vadd.xlane.f32.xlu1 %v82_v27 }
 0x160   :  { %v84_v28 = vpop.xlane.xlu1 %83 }
 0x161   :  { %v85_v29 = vrot.slane %v84_v28, 4 }
 0x163   :  { %v86_v30 = vadd.f32 %v85_v29, %v84_v28 }
 0x165   :  { %v87_v31 = vrot.slane %v86_v30, 2 }
 0x167   :  { %v88_v32 = vadd.f32 %v87_v31, %v86_v30 }
 0x169   :  { %v89_v33 = vrot.slane %v88_v32, 1 }
 0x16b   :  { %v90_v34 = vadd.f32 %v89_v33, %v88_v32 }
 0x16d   :  { %110 = vpush %v90_v34 }
 0x19e   :  { %s111_s16 = spop %110 }
 0x19f   :  { %v92_v35 = vstv %s111_s16 }
 0x1a0   :  { %93 = vst [vmem:[#allocation9] sm:$0xff] %v92_v35 }
 0x1a1   :  { %176 = shalt.err (!%p173_p6)
}
 0x1a2   :  { %s177_s19 = scalar_lea.hbm %s267_s4, 128 }
 0x1a3   :  { %p178_p7 = scmp.ne.s32.totalorder %s267_s4, %s177_s19  ;;  %p181_p8 = scmp.lt.u32.totalorder %s177_s19, %s267_s4 }
 0x1a5   :  { %p183_p9 = pnand %p181_p8, %p178_p7 }
 0x1a7   :  { %186 = shalt.err (!%p183_p9)
}
 0x1a8   :  { %103 = dma.vmem_to_hbm [thread:$0]  %s101_s15, 128, %s267_s4, [#allocation6]  }
 0x1a9   :  { %191 = dma.done.wait [#allocation6], 128  }
 0x1aa   :  { %192 = vsyncadd [#allocation6], 4294967168 }
 0x1ab   :  { %107 = vsyncpa [#allocation5], 1 }
 0x1ac   :  { %108 = vsyncpa [#allocation8], 1 }
 0x1ad   :  { %109 = vsyncpa [#allocation6], 1 }

</bundles_post_ra>
